<compile_context>
chip_gen: v7x
topology: tpu7x:2x2x1
jax: 0.10.0
libtpu: 0.0.40
codegen_flags: <defaults>
</compile_context>

<pallas_src>
import functools

import jax
import jax.numpy as jnp
from jax.experimental import pallas as pl
from jax.experimental.pallas import tpu as pltpu


def _round_up(v, m):
    return (v + m - 1) // m * m


def _vmem_capacity_bytes():
    try:
        return int(pltpu.get_tpu_info().vmem_capacity_bytes)
    except Exception:
        return 64 * 1024 * 1024  # conservative default (v7x per-core VMEM)


def _cbr_kernel(a_ref, w_ref, shift_ref, o_ref, acc_ref, *,
                tk, tn, k_steps, n_steps, w_resident):
    # a_ref:     (tm, tk)                bf16 im2col patch tile
    # w_ref:     resident: (K_pad, Cout_pad) bf16, fetched once, sliced in-kernel
    #            streamed: (tk, tn)          bf16 per-step tile
    # shift_ref: (1, tn)                 f32 folded shift = (bias - mean)*scale + beta
    # o_ref:     (tm, tn)                bf16 output tile
    # acc_ref:   (tm, tn)                f32 accumulator (persists across K steps)
    k = pl.program_id(2)

    @pl.when(k == 0)
    def _init():
        acc_ref[...] = jnp.zeros_like(acc_ref)

    if w_resident:
        k_idx = (pl.ds(pl.multiple_of(k * tk, tk), tk)
                 if k_steps > 1 else slice(None))
        n_idx = (pl.ds(pl.multiple_of(pl.program_id(1) * tn, tn), tn)
                 if n_steps > 1 else slice(None))
        w_tile = w_ref[k_idx, n_idx]
    else:
        w_tile = w_ref[...]

    acc_ref[...] += jnp.dot(a_ref[...], w_tile,
                            preferred_element_type=jnp.float32)

    @pl.when(k == pl.num_programs(2) - 1)
    def _finalize():
        # Padded M rows give relu(shift) != 0 here; they are sliced off by the
        # wrapper, so they are harmless.  Padded Cout lanes are exactly zero.
        y = acc_ref[...] + shift_ref[...]
        o_ref[...] = jnp.maximum(y, 0.0).astype(o_ref.dtype)


def _im2col_nhwc(x_nhwc, kh, kw, stride, padding, dilation):
    n, h, w, cin = x_nhwc.shape
    xp = jnp.pad(x_nhwc, ((0, 0), (padding, padding), (padding, padding), (0, 0)))
    hp, wp = h + 2 * padding, w + 2 * padding
    ho = (hp - dilation * (kh - 1) - 1) // stride + 1
    wo = (wp - dilation * (kw - 1) - 1) // stride + 1
    cols = []
    for i in range(kh):
        for j in range(kw):
            r0 = i * dilation
            c0 = j * dilation
            patch = xp[:, r0:r0 + (ho - 1) * stride + 1:stride,
                       c0:c0 + (wo - 1) * stride + 1:stride, :]
            cols.append(patch)  # (N, Ho, Wo, Cin)
    # concat order -> (kh, kw, cin) along last axis, matching HWIO weight flatten
    a = jnp.concatenate(cols, axis=-1)                   # (N, Ho, Wo, KH*KW*Cin)
    return a.reshape(n * ho * wo, kh * kw * cin), ho, wo


def _conv2d_bn_relu_nhwc(x_nhwc, weight_oihw, conv_bias, gamma, beta,
                         running_mean, running_var,
                         stride, padding, dilation, eps):
    """Core fused op: NHWC in -> NHWC bf16 out (no layout passes)."""
    n, h, w_sp, cin = x_nhwc.shape
    cout, _, kh, kw = weight_oihw.shape

    # im2col in bf16: halves patch-matrix HBM traffic, MXU-native operand.
    # TODO(synk): move im2col into the kernel (grid over kh*kw taps on halo'd
    # NHWC blocks) to remove the KH*KW-fold HBM read amplification entirely.
    a, ho, wo = _im2col_nhwc(x_nhwc.astype(jnp.bfloat16), kh, kw,
                             stride, padding, dilation)
    k_dim = kh * kw * cin
    m = n * ho * wo

    # Fold BN scale into the weight (in f32, then cast to bf16); the kernel
    # epilogue only applies the shift (which also folds the conv bias) + ReLU.
    scale = gamma * jax.lax.rsqrt(running_var + eps)                 # (Cout,)
    bias = conv_bias if conv_bias is not None else 0.0
    shift = (bias - running_mean) * scale + beta                     # (Cout,)
    w_mat = jnp.transpose(weight_oihw, (2, 3, 1, 0)).reshape(k_dim, cout)
    w_mat = (w_mat * scale[None, :]).astype(jnp.bfloat16)

    # ---- generation-aware tile selection ---------------------------------
    cap = _vmem_capacity_bytes()

    # M tile: big tiles amortize ~0.35us/grid-step; keep >=2 M steps when we
    # can so both TensorCores (v7x megacore) get work.
    if m >= 1024:
        tm = 512
    elif m >= 256:
        tm = 256
    else:
        tm = _round_up(m, 8)
    m_pad = _round_up(m, tm)
    m_steps = m_pad // tm

    # N (Cout) tile: lane-dense multiple of 128.  Split when Cout is large
    # (bounds out/acc/W per-step footprint, esp. on 64 MiB v7x) or when a
    # single M step would otherwise idle the second TensorCore.
    cout128 = _round_up(cout, 128)
    if cout128 > 512:
        tn = 512 if cap > (96 << 20) else 256
    elif m_steps == 1 and cout128 >= 256:
        tn = 128
    else:
        tn = cout128
    cout_pad = _round_up(cout, tn)
    n_steps = cout_pad // tn

    # K tile: single full-K step when the double-buffered A tile stays well
    # inside VMEM; otherwise tile wider on 128 MiB parts (v5e/v6e) than on
    # 64 MiB v7x.  Fewer K steps = fewer f32 accumulator RMWs + less step
    # overhead (matters most on v5e's single vst slot).
    if 2 * tm * k_dim * 2 <= cap // 4:
        tk = k_dim
        k_pad = k_dim
    else:
        tk = 1024 if cap > (96 << 20) else 512
        k_pad = _round_up(k_dim, tk)
    k_steps = k_pad // tk

    # Keep the whole (K, Cout) weight VMEM-resident (read from HBM exactly
    # once, vs once per M tile) when it fits; else stream (tk, tn) tiles.
    w_resident = (2 * k_pad * cout_pad * 2) <= min(cap // 3, 24 << 20)

    # ---- padding (padded rows/lanes are inert and sliced off afterwards) --
    if m_pad != m or k_pad != k_dim:
        a = jnp.pad(a, ((0, m_pad - m), (0, k_pad - k_dim)))
    if k_pad != k_dim or cout_pad != cout:
        w_mat = jnp.pad(w_mat, ((0, k_pad - k_dim), (0, cout_pad - cout)))
    shift2d = jnp.pad(shift.reshape(1, cout).astype(jnp.float32),
                      ((0, 0), (0, cout_pad - cout)))

    # ---- VMEM budget / compiler params ------------------------------------
    w_vmem = (2 * k_pad * cout_pad * 2) if w_resident else (2 * tk * tn * 2)
    vmem_need = (2 * tm * tk * 2          # A, double-buffered bf16
                 + w_vmem                 # W
                 + 2 * tm * tn * 2        # out, double-buffered bf16
                 + tm * tn * 4            # f32 accumulator scratch
                 + 2 * 8 * tn * 4)        # shift (sublane-padded)
    vmem_limit = min(int(cap * 0.85),
                     max(32 << 20, int(vmem_need * 1.4) + (8 << 20)))

    grid = (m_steps, n_steps, k_steps)

    if w_resident:
        w_spec = pl.BlockSpec((k_pad, cout_pad), lambda i, j, k: (0, 0))
    else:
        w_spec = pl.BlockSpec((tk, tn), lambda i, j, k: (k, j))

    cost = pl.CostEstimate(
        flops=2 * m_pad * k_pad * cout_pad,
        transcendentals=0,
        bytes_accessed=(m_pad * k_pad * 2                                  # A (bf16)
                        + (1 if w_resident else m_steps) * k_pad * cout_pad * 2  # W
                        + m_pad * cout_pad * 2),                           # out (bf16)
    )

    kernel = functools.partial(_cbr_kernel, tk=tk, tn=tn, k_steps=k_steps,
                               n_steps=n_steps, w_resident=w_resident)

    out = pl.pallas_call(
        kernel,
        out_shape=jax.ShapeDtypeStruct((m_pad, cout_pad), jnp.bfloat16),
        grid_spec=pltpu.PrefetchScalarGridSpec(
            num_scalar_prefetch=0,
            grid=grid,
            in_specs=[
                pl.BlockSpec((tm, tk), lambda i, j, k: (i, k)),
                w_spec,
                pl.BlockSpec((1, tn), lambda i, j, k: (0, j)),
            ],
            out_specs=pl.BlockSpec((tm, tn), lambda i, j, k: (i, j)),
            scratch_shapes=[pltpu.VMEM((tm, tn), jnp.float32)],
        ),
        compiler_params=pltpu.CompilerParams(
            dimension_semantics=("parallel", "parallel", "arbitrary"),
            vmem_limit_bytes=vmem_limit,
        ),
        cost_estimate=cost,
    )(a, w_mat, shift2d)

    return out[:m, :cout].reshape(n, ho, wo, cout)      # NHWC, bf16


@functools.partial(jax.jit, static_argnames=("stride", "padding", "dilation", "eps"))
def conv2d_bn_relu(x_nchw, weight_oihw, conv_bias, gamma, beta,
                   running_mean, running_var,
                   stride=1, padding=1, dilation=1, eps=1e-5):
    # TODO(synk): the NCHW<->NHWC transposes are extra full-HBM passes kept only
    # to match the PyTorch layout; callers that can use NHWC should call
    # _conv2d_bn_relu_nhwc directly and keep the bf16 result.
    x_nhwc = jnp.transpose(x_nchw, (0, 2, 3, 1))
    out = _conv2d_bn_relu_nhwc(x_nhwc, weight_oihw, conv_bias, gamma, beta,
                               running_mean, running_var,
                               stride, padding, dilation, eps)
    return jnp.transpose(out, (0, 3, 1, 2)).astype(x_nchw.dtype)  # back to NCHW


def _reference(x_nchw, weight, bias, gamma, beta, mean, var,
               stride, padding, dilation, eps):
    y = jax.lax.conv_general_dilated(
        x_nchw, weight,
        window_strides=(stride, stride),
        padding=((padding, padding), (padding, padding)),
        rhs_dilation=(dilation, dilation),
        dimension_numbers=("NCHW", "OIHW", "NCHW"))
    y = y + bias.reshape(1, -1, 1, 1)
    y = (y - mean.reshape(1, -1, 1, 1)) * jax.lax.rsqrt(
        var.reshape(1, -1, 1, 1) + eps) * gamma.reshape(1, -1, 1, 1) \
        + beta.reshape(1, -1, 1, 1)
    return jnp.maximum(y, 0.0)


if __name__ == "__main__":
    # Module config: conv2DBatchNormRelu(in_channels=4, n_filters=8, k_size=3,
    #                                    padding=1, stride=1, bias=True, dilation=1)
    N, Cin, H, W = 2, 4, 16, 16
    Cout, K = 8, 3
    stride, padding, dilation, eps = 1, 1, 1, 1e-5

    key = jax.random.PRNGKey(0)
    kx, kw_, kb, kg, kbe, km, kv = jax.random.split(key, 7)

    x = jax.random.normal(kx, (N, Cin, H, W), dtype=jnp.float32)
    weight = jax.random.normal(kw_, (Cout, Cin, K, K), dtype=jnp.float32) * 0.1
    conv_bias = jax.random.normal(kb, (Cout,), dtype=jnp.float32) * 0.1
    gamma = 1.0 + 0.1 * jax.random.normal(kg, (Cout,), dtype=jnp.float32)
    beta = 0.1 * jax.random.normal(kbe, (Cout,), dtype=jnp.float32)
    running_mean = 0.1 * jax.random.normal(km, (Cout,), dtype=jnp.float32)
    running_var = jnp.abs(jax.random.normal(kv, (Cout,), dtype=jnp.float32)) + 0.5

    out = conv2d_bn_relu(x, weight, conv_bias, gamma, beta,
                         running_mean, running_var,
                         stride=stride, padding=padding,
                         dilation=dilation, eps=eps)
    out = jax.block_until_ready(out)

    ref = _reference(x, weight, conv_bias, gamma, beta, running_mean,
                     running_var, stride, padding, dilation, eps)
    assert out.shape == (N, Cout, H, W), out.shape
    # bf16 MXU operands + bf16 kernel output (f32 accumulation) -> inference-grade
    # tolerance vs the pure-f32 reference.
    assert jnp.allclose(out, ref, rtol=5e-2, atol=5e-2), \
        float(jnp.max(jnp.abs(out - ref)))
    print("KERNEL_OK")
</pallas_src>

<mosaic_0001>
module attributes {stable_mosaic.version = 11 : i64} {
  func.func @_cbr_kernel(%arg0: i32, %arg1: i32, %arg2: i32, %arg3: memref<256x36xbf16, #tpu.memory_space<vmem>>, %arg4: memref<36x128xbf16, #tpu.memory_space<vmem>>, %arg5: memref<1x128xf32, #tpu.memory_space<vmem>>, %arg6: memref<256x128xbf16, #tpu.memory_space<vmem>>, %arg7: memref<256x128xf32, #tpu.memory_space<vmem>>) attributes {dimension_semantics = [#tpu.dimension_semantics<parallel>, #tpu.dimension_semantics<parallel>, #tpu.dimension_semantics<arbitrary>], iteration_bounds = array<i64: 2, 1, 1>, scalar_prefetch = 0 : i64, scratch_operands = 1 : i64, tpu.core_type = #tpu.core_type<tc>, window_params = [{transform_indices = @transform_0, window_bounds = array<i64: 256, 36>}, {pipeline_mode = #tpu.pipeline_mode<synchronous>, transform_indices = @transform_1, window_bounds = array<i64: 36, 128>}, {transform_indices = @transform_2, window_bounds = array<i64: 1, 128>}, {transform_indices = @transform_3, window_bounds = array<i64: 256, 128>}]} {
    %c0_i32 = arith.constant 0 : i32
    %0 = arith.cmpi eq, %arg2, %c0_i32 : i32
    %1 = arith.extui %0 : i1 to i32
    %c0_i32_0 = arith.constant 0 : i32
    %2 = arith.cmpi ne, %1, %c0_i32_0 : i32
    scf.if %2 {
      %cst_10 = arith.constant 0.000000e+00 : f32
      %12 = vector.broadcast %cst_10 : f32 to vector<256x128xf32>
      %c0_11 = arith.constant 0 : index
      %c0_12 = arith.constant 0 : index
      %13 = vector.load %arg7[%c0_11, %c0_12] : memref<256x128xf32, #tpu.memory_space<vmem>>, vector<256x128xf32>
      tpu.vector_store %arg7[%c0_11, %c0_12], %12 {strides = array<i32>} : memref<256x128xf32, #tpu.memory_space<vmem>>, vector<256x128xf32>,
    } else {
    }
    %c0 = arith.constant 0 : index
    %c0_1 = arith.constant 0 : index
    %3 = vector.load %arg4[%c0, %c0_1] : memref<36x128xbf16, #tpu.memory_space<vmem>>, vector<36x128xbf16>
    %c0_2 = arith.constant 0 : index
    %c0_3 = arith.constant 0 : index
    %4 = vector.load %arg7[%c0_2, %c0_3] : memref<256x128xf32, #tpu.memory_space<vmem>>, vector<256x128xf32>
    %c0_4 = arith.constant 0 : index
    %c0_5 = arith.constant 0 : index
    %5 = vector.load %arg3[%c0_4, %c0_5] : memref<256x36xbf16, #tpu.memory_space<vmem>>, vector<256x36xbf16>
    %cst = arith.constant dense<0.000000e+00> : vector<256x128xf32>
    %6 = tpu.matmul %5, %3, %cst {dimension_numbers = #tpu.dot_dimension_numbers<[1], [0], [0], [1], [0, 0, 1, 1], [], []>} : vector<256x36xbf16>, vector<36x128xbf16>, vector<256x128xf32> -> vector<256x128xf32>
    %7 = arith.addf %4, %6 : vector<256x128xf32>
    %c0_6 = arith.constant 0 : index
    %c0_7 = arith.constant 0 : index
    %8 = vector.load %arg7[%c0_6, %c0_7] : memref<256x128xf32, #tpu.memory_space<vmem>>, vector<256x128xf32>
    tpu.vector_store %arg7[%c0_6, %c0_7], %7 {strides = array<i32>} : memref<256x128xf32, #tpu.memory_space<vmem>>, vector<256x128xf32>,
    %c0_i32_8 = arith.constant 0 : i32
    %9 = arith.cmpi eq, %arg2, %c0_i32_8 : i32
    %10 = arith.extui %9 : i1 to i32
    %c0_i32_9 = arith.constant 0 : i32
    %11 = arith.cmpi ne, %10, %c0_i32_9 : i32
    scf.if %11 {
      %c0_10 = arith.constant 0 : index
      %c0_11 = arith.constant 0 : index
      %12 = vector.load %arg7[%c0_10, %c0_11] : memref<256x128xf32, #tpu.memory_space<vmem>>, vector<256x128xf32>
      %c0_12 = arith.constant 0 : index
      %c0_13 = arith.constant 0 : index
      %13 = vector.load %arg5[%c0_12, %c0_13] : memref<1x128xf32, #tpu.memory_space<vmem>>, vector<1x128xf32>
      %14 = vector.broadcast %13 : vector<1x128xf32> to vector<256x128xf32>
      %15 = arith.addf %12, %14 : vector<256x128xf32>
      %cst_14 = arith.constant 0.000000e+00 : f32
      %16 = vector.broadcast %cst_14 : f32 to vector<256x128xf32>
      %17 = arith.maximumf %15, %16 : vector<256x128xf32>
      %18 = arith.truncf %17 : vector<256x128xf32> to vector<256x128xbf16>
      %c0_15 = arith.constant 0 : index
      %c0_16 = arith.constant 0 : index
      %19 = vector.load %arg6[%c0_15, %c0_16] : memref<256x128xbf16, #tpu.memory_space<vmem>>, vector<256x128xbf16>
      tpu.vector_store %arg6[%c0_15, %c0_16], %18 {strides = array<i32>} : memref<256x128xbf16, #tpu.memory_space<vmem>>, vector<256x128xbf16>,
    } else {
    }
    return
  }
  func.func @transform_0(%arg0: i32, %arg1: i32, %arg2: i32) -> (i32, i32) {
    %c0_i32 = arith.constant 0 : i32
    return %arg0, %arg2 : i32, i32
  }
  func.func @transform_1(%arg0: i32, %arg1: i32, %arg2: i32) -> (i32, i32) {
    %c0_i32 = arith.constant 0 : i32
    %c0_i32_0 = arith.constant 0 : i32
    %c0_i32_1 = arith.constant 0 : i32
    return %c0_i32, %c0_i32_0 : i32, i32
  }
  func.func @transform_2(%arg0: i32, %arg1: i32, %arg2: i32) -> (i32, i32) {
    %c0_i32 = arith.constant 0 : i32
    %c0_i32_0 = arith.constant 0 : i32
    return %c0_i32, %arg1 : i32, i32
  }
  func.func @transform_3(%arg0: i32, %arg1: i32, %arg2: i32) -> (i32, i32) {
    %c0_i32 = arith.constant 0 : i32
    return %arg0, %arg1 : i32, i32
  }
}

</mosaic_0001>

<bundles_post_ra>
// kernel: conv2d_bn_relu.1
= control target key start
LH: loop header
LB: loop body
LE: loop exit
PB: predicated region body
PF: predicated region fallthrough
CT: control target
= control target key end

     0   :  { %s1423_s12 = smov 0   ;;  %s1425_s13 = smov 0   ;;  %s1561_s0 = inlined_call_operand.vmem [shape: bf16[512,36], index: 0, kind: input, shape index: {}]   ;;  %s1562_s1 = inlined_call_operand.vmem [shape: bf16[36,128], index: 1, kind: input, shape index: {}]   ;;  %s1563_s2 = inlined_call_operand.vmem [shape: f32[1,128], index: 2, kind: input, shape index: {}]   ;;  %s1564_s3 = inlined_call_operand.vmem [shape: bf16[512,128], index: 3, kind: output, shape index: {}]  }
   0x1   :  { %s1427_s14 = smov 0  }
   0x2 LB: > { %s32_s15 = sadd.s32 1, %s1397_s13  ;;  %p1069_p0 = scmp.ge.s32.totalorder %s1401_s14, 1  ;;  %s1401_s14 = sphi %s1427_s14, %s13_s14   ;;  %s1397_s13 = sphi %s1425_s13, %s1566_s13   ;;  %s1393_s12 = sphi %s1423_s12, %s1565_s12  }
   0x3   : > { %p34_p1 = scmp.ge.s32.totalorder %s32_s15, 2  ;;  %p172_p2 = scmp.lt.s32.totalorder %s1401_s14, 3 }
   0x5   : > { %s1568_s15 = smov (%p34_p1, %s32_s15), 0  ;;  %p173_p3 = pnand %p1069_p0, %p172_p2 }
   0x6   : > { %v1360_v0 = vld [vmem:[%s1562_s1] sm:$0xff] (!%p173_p3)   ;;  %v1361_v1 = vld [vmem:[%s1562_s1 + $0x8] sm:$0xff] (!%p173_p3)   ;;  %s1070_s20 = sshll.u32 (!%p173_p3), %s1393_s12, 5  ;;  %v1362_v2 = vld [vmem:[%s1562_s1 + $0x10] ss:$0 sps:$4 sm:$0x33] (!%p173_p3)  }
   0x7   : > { %176 = sbr.rel (%p173_p3) target bundleno = 266 (0x10a), region = 32  ;;  %1290 = vmatprep.subr.bf16.mxu0 (!%p173_p3), %v1360_v0  ;;  %1328 = vmatprep.subr.bf16.mxu1 (!%p173_p3), %v1360_v0  ;;  %p206_p4 = scmp.lt.s32.totalorder (!%p173_p3), %s1070_s20, 63  ;;  %vm476_vm0 = vcmask (!%p173_p3), 1041408   ;;  %vm427_vm1 = vcmask (!%p173_p3), 293888   ;;  %v1495_v20 = vld [vmem:[%s1563_s2] ss:$0 sm:$0xff] (!%p173_p3) }
   0x8   : > { %1291 = vmatpush3.bf16.msra.mxu0 (!%p173_p3), %v1360_v0  ;;  %1331 = vmatpush3.bf16.msra.mxu1 (!%p173_p3), %v1360_v0  ;;  %v478_v3 = vsel (!%p173_p3), %vm476_vm0, %v1362_v2, 0 }
   0x9   : > { %1292 = vmatprep.subr.bf16.mxu0 (!%p173_p3), %v1361_v1  ;;  %1329 = vmatprep.subr.bf16.mxu1 (!%p173_p3), %v1361_v1 }
   0xc   : > { %1293 = vmatpush3.bf16.msra.mxu0 (!%p173_p3), %v1361_v1  ;;  %1332 = vmatpush3.bf16.msra.mxu1 (!%p173_p3), %v1361_v1 }
   0xd   : > { %1334 = vmatprep.subr.msk.bf16.mxu0 (!%p173_p3), %vm476_vm0, %v1362_v2  ;;  %1335 = vmatprep.subr.msk.bf16.mxu1 (!%p173_p3), %vm476_vm0, %v1362_v2 }
   0xe   : > { %s1570_s20 = smov (!%p206_p4, %s1070_s20), 63 }
   0xf   : > { %s1071_s23 = sshll.u32 %s1570_s20, 2 }
  0x10   : > { %s1458_s26 = scalar_lea.vmem %s1561_s0, %s1071_s23  ;;  %1295 = vmatpush3.bf16.msra.mxu0 %v478_v3  ;;  %1333 = vmatpush3.bf16.msra.mxu1 %v478_v3  ;;  %s1510_s4 = scalar_lea.vmem %s1564_s3, %s1071_s23 }
  0x11   : > { %v1363_v4 = vld [vmem:[%s1458_s26] sm:$0xff]   ;;  %v1365_v6 = vld [vmem:[%s1458_s26 + $0x8] sm:$0xff]   ;;  %v1367_v8 = vld [vmem:[%s1458_s26 + $0x10] sm:$0xff]  }
  0x12   : > { %v1364_v5 = vld [vmem:[%s1458_s26 + $0x40] sm:$0xff]   ;;  %1296 = vmatprep.mubr.msk.bf16.mxu0 %vm427_vm1, %v1363_v4  ;;  %v1366_v7 = vld [vmem:[%s1458_s26 + $0x48] sm:$0xff]   ;;  %v1368_v9 = vld [vmem:[%s1458_s26 + $0x50] sm:$0xff]  }
  0x13   : > { %1312 = vmatprep.mubr.msk.bf16.mxu1 %vm427_vm1, %v1364_v5  ;;  %1297 = vmatmul.mubr.msk.bf16.vlgmr.msra.gmra.mrb[0].mxu0 %vm427_vm1, %v1365_v6  ;;  %v1369_v10 = vld [vmem:[%s1458_s26 + $0x18] sm:$0xff]   ;;  %v1371_v12 = vld [vmem:[%s1458_s26 + $0x20] sm:$0xff]   ;;  %v1373_v14 = vld [vmem:[%s1458_s26 + $0x28] sm:$0xff]  }
  0x14   : > { %1313 = vmatmul.mubr.msk.bf16.vlgmr.msra.gmra.mrb[0].mxu1 %vm427_vm1, %v1366_v7  ;;  %1300 = vmatprep.mubr.msk.bf16.mxu0 %vm427_vm1, %v1367_v8  ;;  %v1370_v11 = vld [vmem:[%s1458_s26 + $0x58] sm:$0xff]   ;;  %v1372_v13 = vld [vmem:[%s1458_s26 + $0x60] sm:$0xff]   ;;  %v1374_v15 = vld [vmem:[%s1458_s26 + $0x68] sm:$0xff]  }
  0x15   : > { %1316 = vmatprep.mubr.msk.bf16.mxu1 %vm427_vm1, %v1368_v9  ;;  %v1375_v16 = vld [vmem:[%s1458_s26 + $0x30] sm:$0xff]   ;;  %v1377_v18 = vld [vmem:[%s1458_s26 + $0x38] sm:$0xff]  }
  0x16   : > { %v1376_v17 = vld [vmem:[%s1458_s26 + $0x70] sm:$0xff]   ;;  %v1378_v19 = vld [vmem:[%s1458_s26 + $0x78] sm:$0xff]  }
  0x1b   : > { %1301 = vmatmul.mubr.msk.bf16.gmra.mrb[4].mxu0 %vm427_vm1, %v1369_v10 }
  0x1c   : > { %1317 = vmatmul.mubr.msk.bf16.gmra.mrb[4].mxu1 %vm427_vm1, %v1370_v11  ;;  %1304 = vmatprep.mubr.msk.bf16.mxu0 %vm427_vm1, %v1371_v12 }
  0x1d   : > { %1320 = vmatprep.mubr.msk.bf16.mxu1 %vm427_vm1, %v1372_v13 }
  0x23   : > { %1305 = vmatmul.mubr.msk.bf16.gmra.mrb[8].mxu0 %vm427_vm1, %v1373_v14 }
  0x24   : > { %1321 = vmatmul.mubr.msk.bf16.gmra.mrb[8].mxu1 %vm427_vm1, %v1374_v15  ;;  %1308 = vmatprep.mubr.msk.bf16.mxu0 %vm427_vm1, %v1375_v16 }
  0x25   : > { %1324 = vmatprep.mubr.msk.bf16.mxu1 %vm427_vm1, %v1376_v17 }
  0x2b   : > { %1309 = vmatmul.mubr.msk.bf16.gmra.mrb[12].mxu0 %vm427_vm1, %v1377_v18 }
  0x2c   : > { %1325 = vmatmul.mubr.msk.bf16.gmra.mrb[12].mxu1 %vm427_vm1, %v1378_v19 }
  0xe6   : > { %v1298_v21 = vpop.f32.mrb[0].mxu0 }
  0xe7   : > { %v1314_v22 = vpop.f32.mrb[0].mxu1  ;;  %v749_v23 = vadd.f32 %v1298_v21, %v1495_v20  ;;  %v514_v25 = vpop.f32.mrb[1].mxu0 }
  0xe8   : > { %v765_v24 = vadd.f32 %v1314_v22, %v1495_v20  ;;  %v578_v26 = vpop.f32.mrb[1].mxu1  ;;  %v747_v27 = vadd.f32 %v1495_v20, %v514_v25  ;;  %v1299_v29 = vpop.f32.mrb[2].mxu0 }
  0xe9   : > { %v763_v28 = vadd.f32 %v1495_v20, %v578_v26  ;;  %v1315_v30 = vpop.f32.mrb[2].mxu1  ;;  %v750_v31 = vadd.f32 %v1299_v29, %v1495_v20  ;;  %v517_v33 = vpop.f32.mrb[3].mxu0  ;;  %v781_v37 = vmax.f32 %v749_v23, 0.0 }
  0xea   : > { %v766_v32 = vadd.f32 %v1315_v30, %v1495_v20  ;;  %v581_v34 = vpop.f32.mrb[3].mxu1  ;;  %v748_v35 = vadd.f32 %v1495_v20, %v517_v33  ;;  %v797_v38 = vmax.f32 %v765_v24, 0.0  ;;  %v779_v41 = vmax.f32 %v747_v27, 0.0 }
  0xeb   : > { %v764_v36 = vadd.f32 %v1495_v20, %v581_v34  ;;  %v782_v39 = vmax.f32 %v750_v31, 0.0  ;;  %v795_v42 = vmax.f32 %v763_v28, 0.0 }
  0xec   : > { %v798_v40 = vmax.f32 %v766_v32, 0.0  ;;  %v780_v43 = vmax.f32 %v748_v35, 0.0 }
  0xed   : > { %v796_v44 = vmax.f32 %v764_v36, 0.0  ;;  %v1184_v45 = vpack.c.bf16 %v782_v39, %v781_v37 }
  0xee   : > { %v1224_v46 = vpack.c.bf16 %v798_v40, %v797_v38  ;;  %v1179_v47 = vpack.c.bf16 %v780_v43, %v779_v41  ;;  %v1302_v49 = vpop.f32.mrb[4].mxu0 }
  0xef   : > { %v1219_v48 = vpack.c.bf16 %v796_v44, %v795_v42  ;;  %v1318_v50 = vpop.f32.mrb[4].mxu1  ;;  %1256 = vst [vmem:[%s1510_s4 + $0x8] sm:$0xff] %v1184_v45   ;;  %v753_v51 = vadd.f32 %v1302_v49, %v1495_v20  ;;  %v530_v53 = vpop.f32.mrb[5].mxu0 }
  0xf0   : > { %1264 = vst [vmem:[%s1510_s4 + $0x48] sm:$0xff] %v1224_v46   ;;  %v769_v52 = vadd.f32 %v1318_v50, %v1495_v20  ;;  %v594_v54 = vpop.f32.mrb[5].mxu1  ;;  %1180 = vst [vmem:[%s1510_s4] sm:$0xff] %v1179_v47   ;;  %v751_v55 = vadd.f32 %v1495_v20, %v530_v53  ;;  %v1303_v57 = vpop.f32.mrb[6].mxu0 }
  0xf1   : > { %1263 = vst [vmem:[%s1510_s4 + $0x40] sm:$0xff] %v1219_v48   ;;  %v767_v56 = vadd.f32 %v1495_v20, %v594_v54  ;;  %v1319_v58 = vpop.f32.mrb[6].mxu1  ;;  %v754_v59 = vadd.f32 %v1303_v57, %v1495_v20  ;;  %v533_v61 = vpop.f32.mrb[7].mxu0  ;;  %v785_v1 = vmax.f32 %v753_v51, 0.0 }
  0xf2   : > { %v770_v60 = vadd.f32 %v1319_v58, %v1495_v20  ;;  %v597_v62 = vpop.f32.mrb[7].mxu1  ;;  %v752_v63 = vadd.f32 %v1495_v20, %v533_v61  ;;  %v801_v2 = vmax.f32 %v769_v52, 0.0  ;;  %v783_v5 = vmax.f32 %v751_v55, 0.0 }
  0xf3   : > { %v768_v0 = vadd.f32 %v1495_v20, %v597_v62  ;;  %v786_v3 = vmax.f32 %v754_v59, 0.0  ;;  %v799_v6 = vmax.f32 %v767_v56, 0.0 }
  0xf4   : > { %v802_v4 = vmax.f32 %v770_v60, 0.0  ;;  %v784_v7 = vmax.f32 %v752_v63, 0.0 }
  0xf5   : > { %v800_v8 = vmax.f32 %v768_v0, 0.0  ;;  %v1194_v9 = vpack.c.bf16 %v786_v3, %v785_v1 }
  0xf6   : > { %v1234_v10 = vpack.c.bf16 %v802_v4, %v801_v2  ;;  %v1189_v11 = vpack.c.bf16 %v784_v7, %v783_v5  ;;  %v1306_v13 = vpop.f32.mrb[8].mxu0 }
  0xf7   : > { %v1229_v12 = vpack.c.bf16 %v800_v8, %v799_v6  ;;  %v1322_v14 = vpop.f32.mrb[8].mxu1  ;;  %1258 = vst [vmem:[%s1510_s4 + $0x18] sm:$0xff] %v1194_v9   ;;  %v757_v15 = vadd.f32 %v1306_v13, %v1495_v20  ;;  %v546_v17 = vpop.f32.mrb[9].mxu0 }
  0xf8   : > { %1266 = vst [vmem:[%s1510_s4 + $0x58] sm:$0xff] %v1234_v10   ;;  %v773_v16 = vadd.f32 %v1322_v14, %v1495_v20  ;;  %v610_v18 = vpop.f32.mrb[9].mxu1  ;;  %1257 = vst [vmem:[%s1510_s4 + $0x10] sm:$0xff] %v1189_v11   ;;  %v755_v19 = vadd.f32 %v1495_v20, %v546_v17  ;;  %v1307_v22 = vpop.f32.mrb[10].mxu0 }
  0xf9   : > { %1265 = vst [vmem:[%s1510_s4 + $0x50] sm:$0xff] %v1229_v12   ;;  %v771_v21 = vadd.f32 %v1495_v20, %v610_v18  ;;  %v1323_v23 = vpop.f32.mrb[10].mxu1  ;;  %v758_v24 = vadd.f32 %v1307_v22, %v1495_v20  ;;  %v549_v26 = vpop.f32.mrb[11].mxu0  ;;  %v789_v30 = vmax.f32 %v757_v15, 0.0 }
  0xfa   : > { %v774_v25 = vadd.f32 %v1323_v23, %v1495_v20  ;;  %v613_v27 = vpop.f32.mrb[11].mxu1  ;;  %v756_v28 = vadd.f32 %v1495_v20, %v549_v26  ;;  %v805_v31 = vmax.f32 %v773_v16, 0.0  ;;  %v787_v34 = vmax.f32 %v755_v19, 0.0 }
  0xfb   : > { %v772_v29 = vadd.f32 %v1495_v20, %v613_v27  ;;  %v790_v32 = vmax.f32 %v758_v24, 0.0  ;;  %v803_v35 = vmax.f32 %v771_v21, 0.0 }
  0xfc   : > { %v806_v33 = vmax.f32 %v774_v25, 0.0  ;;  %v788_v36 = vmax.f32 %v756_v28, 0.0 }
  0xfd   : > { %v804_v37 = vmax.f32 %v772_v29, 0.0  ;;  %v1204_v38 = vpack.c.bf16 %v790_v32, %v789_v30 }
  0xfe   : > { %v1244_v39 = vpack.c.bf16 %v806_v33, %v805_v31  ;;  %v1199_v40 = vpack.c.bf16 %v788_v36, %v787_v34  ;;  %v1310_v42 = vpop.f32.mrb[12].mxu0 }
  0xff   : > { %v1239_v41 = vpack.c.bf16 %v804_v37, %v803_v35  ;;  %v1326_v43 = vpop.f32.mrb[12].mxu1  ;;  %1260 = vst [vmem:[%s1510_s4 + $0x28] sm:$0xff] %v1204_v38   ;;  %v761_v44 = vadd.f32 %v1310_v42, %v1495_v20  ;;  %v562_v46 = vpop.f32.mrb[13].mxu0 }
 0x100   : > { %1268 = vst [vmem:[%s1510_s4 + $0x68] sm:$0xff] %v1244_v39   ;;  %v777_v45 = vadd.f32 %v1326_v43, %v1495_v20  ;;  %v626_v47 = vpop.f32.mrb[13].mxu1  ;;  %1259 = vst [vmem:[%s1510_s4 + $0x20] sm:$0xff] %v1199_v40   ;;  %v759_v48 = vadd.f32 %v1495_v20, %v562_v46  ;;  %v1311_v50 = vpop.f32.mrb[14].mxu0 }
 0x101   : > { %1267 = vst [vmem:[%s1510_s4 + $0x60] sm:$0xff] %v1239_v41   ;;  %v775_v49 = vadd.f32 %v1495_v20, %v626_v47  ;;  %v1327_v51 = vpop.f32.mrb[14].mxu1  ;;  %v762_v52 = vadd.f32 %v1311_v50, %v1495_v20  ;;  %v565_v54 = vpop.f32.mrb[15].mxu0  ;;  %v793_v58 = vmax.f32 %v761_v44, 0.0 }
 0x102   : > { %v778_v53 = vadd.f32 %v1327_v51, %v1495_v20  ;;  %v629_v55 = vpop.f32.mrb[15].mxu1  ;;  %v760_v56 = vadd.f32 %v1495_v20, %v565_v54  ;;  %v809_v59 = vmax.f32 %v777_v45, 0.0  ;;  %v791_v62 = vmax.f32 %v759_v48, 0.0 }
 0x103   : > { %v776_v57 = vadd.f32 %v1495_v20, %v629_v55  ;;  %v794_v60 = vmax.f32 %v762_v52, 0.0  ;;  %v807_v63 = vmax.f32 %v775_v49, 0.0 }
 0x104   : > { %v810_v61 = vmax.f32 %v778_v53, 0.0  ;;  %v792_v0 = vmax.f32 %v760_v56, 0.0 }
 0x105   : > { %v808_v1 = vmax.f32 %v776_v57, 0.0  ;;  %v1214_v2 = vpack.c.bf16 %v794_v60, %v793_v58 }
 0x106   : > { %v1254_v3 = vpack.c.bf16 %v810_v61, %v809_v59  ;;  %v1209_v4 = vpack.c.bf16 %v792_v0, %v791_v62 }
 0x107   : > { %v1249_v5 = vpack.c.bf16 %v808_v1, %v807_v63  ;;  %1262 = vst [vmem:[%s1510_s4 + $0x38] sm:$0xff] %v1214_v2  }
 0x108   : > { %1270 = vst [vmem:[%s1510_s4 + $0x78] sm:$0xff] %v1254_v3   ;;  %1261 = vst [vmem:[%s1510_s4 + $0x30] sm:$0xff] %v1209_v4  }
 0x109   : > { %1269 = vst [vmem:[%s1510_s4 + $0x70] sm:$0xff] %v1249_v5  }
 0x10a PF: > { %s13_s14 = sadd.s32 1, %s1401_s14   ;;  %s1565_s12 = smov %s1397_s13 }
 0x10b   : > { %p10_p5 = scmp.ge.s32.totalorder %s13_s14, 4   ;;  %s1566_s13 = smov %s1568_s15 }
 0x10d   :  { %12 = sbr.rel (!%p10_p5) target bundleno = 2 (0x2), region = 73 }

</bundles_post_ra>
